<compile_context>
chip_gen: v5e
topology: v5e:2x2
jax: 0.10.0
libtpu: 0.0.40
codegen_flags: <defaults>
</compile_context>

<pallas_src>
import jax
import jax.numpy as jnp
from jax.experimental import pallas as pl
from jax.experimental.pallas import tpu as pltpu


def _matmul_kernel(a_ref, b_ref, o_ref):
    # Full-f32-fidelity product (matches the CUDA float kernel); accumulate
    # into the resident output tile (output index_map ignores k, k is the
    # innermost "arbitrary" grid axis).
    prod = jnp.dot(
        a_ref[...],
        b_ref[...],
        preferred_element_type=jnp.float32,
        precision=jax.lax.Precision.HIGHEST,
    )
    k = pl.program_id(2)

    @pl.when(k == 0)
    def _():
        o_ref[...] = prod

    @pl.when(k != 0)
    def _():
        o_ref[...] += prod


def _largest_divisor(n: int, candidates) -> int:
    for c in candidates:
        if n % c == 0:
            return c
    return n


def _choose_tiles(n_pad: int):
    """Pick (tm, tn, tk) for an n_pad x n_pad problem (n_pad % 256 == 0)."""
    if n_pad >= 2048:
        tm = _largest_divisor(n_pad, (1024, 512, 256))
        tk = _largest_divisor(n_pad, (512, 256))
    elif n_pad >= 1024:
        tm = _largest_divisor(n_pad, (512, 256))
        tk = _largest_divisor(n_pad, (1024, 512, 256))
    else:
        tm = 256
        tk = _largest_divisor(n_pad, (512, 256))
    return tm, tm, tk


def _vmem_limit_bytes(tm: int, tn: int, tk: int) -> int:
    # Double-buffered A/B tiles + (conservatively) double-buffered f32 output.
    work = (2 * (tm * tk + tk * tn) + 2 * tm * tn) * 4
    try:
        cap = int(pltpu.get_tpu_info().vmem_capacity_bytes)
    except Exception:  # pragma: no cover - robustness across jax versions
        cap = 64 * 1024 * 1024
    # Leave headroom for compiler scratch; v7x (64 MiB) -> ~48 MiB ceiling,
    # v5e/v6e (128 MiB) -> ~112 MiB ceiling.
    cap = max(cap - 16 * 1024 * 1024, 32 * 1024 * 1024)
    return int(min(max(2 * work, 32 * 1024 * 1024), cap))


def _pallas_matmul(A: jax.Array, B: jax.Array, tm: int, tn: int, tk: int) -> jax.Array:
    N = A.shape[0]
    grid = (N // tm, N // tn, N // tk)

    # A is re-read once per j block, B once per i block, C written once.
    bytes_accessed = (grid[1] + grid[0] + 1) * N * N * 4
    cost = pl.CostEstimate(
        flops=2 * N * N * N, transcendentals=0, bytes_accessed=bytes_accessed
    )

    return pl.pallas_call(
        _matmul_kernel,
        out_shape=jax.ShapeDtypeStruct((N, N), jnp.float32),
        grid_spec=pltpu.PrefetchScalarGridSpec(
            num_scalar_prefetch=0,
            grid=grid,
            in_specs=[
                pl.BlockSpec((tm, tk), lambda i, j, k: (i, k)),
                pl.BlockSpec((tk, tn), lambda i, j, k: (k, j)),
            ],
            out_specs=pl.BlockSpec((tm, tn), lambda i, j, k: (i, j)),
        ),
        compiler_params=pltpu.CompilerParams(
            dimension_semantics=("parallel", "parallel", "arbitrary"),
            vmem_limit_bytes=_vmem_limit_bytes(tm, tn, tk),
        ),
        cost_estimate=cost,
    )(A, B)


def matrix_multiply(A: jax.Array, B: jax.Array) -> jax.Array:
    """C = A @ B for square float32 matrices (matches the CUDA kernel)."""
    A = jnp.asarray(A, jnp.float32)
    B = jnp.asarray(B, jnp.float32)
    N = A.shape[0]
    assert A.shape == B.shape == (N, N), "expected square matrices of equal size"

    # Tiny: single grid point, block shape == full array (exempt from the
    # (8,128) divisibility rule), minimal pallas_call overhead.
    if N <= 256:
        return _pallas_matmul(A, B, N, N, N)

    # Mid-size: when the row dim splits cleanly into two 128-aligned halves,
    # use two parallel row blocks so both v7x TensorCores get work
    # (harmless on single-TC v5e/v6e). Otherwise keep the single-block path.
    if N <= 512:
        if N % 256 == 0:
            return _pallas_matmul(A, B, N // 2, N, N)
        return _pallas_matmul(A, B, N, N, N)

    # General path: pad to a multiple of 256 so tiles never degrade below the
    # MXU-native 256 granularity; zero padding does not change the valid
    # region of the product.
    n_pad = ((N + 255) // 256) * 256
    if n_pad != N:
        pad = n_pad - N
        A = jnp.pad(A, ((0, pad), (0, pad)))
        B = jnp.pad(B, ((0, pad), (0, pad)))

    tm, tn, tk = _choose_tiles(n_pad)
    C = _pallas_matmul(A, B, tm, tn, tk)
    if n_pad != N:
        C = C[:N, :N]
    return C


if __name__ == "__main__":
    key = jax.random.PRNGKey(0)

    # N=128: single-block fast path.
    # N=512: two-row-block split path (v7x megacore friendly).
    # N=600: pad-to-768 path with 256 tiles.
    for N in (128, 512, 600):
        k_a, k_b = jax.random.split(jax.random.fold_in(key, N))
        A = jax.random.normal(k_a, (N, N), dtype=jnp.float32)
        B = jax.random.normal(k_b, (N, N), dtype=jnp.float32)

        C = matrix_multiply(A, B)
        jax.block_until_ready(C)

        C_ref = jnp.matmul(A, B, precision=jax.lax.Precision.HIGHEST)
        assert jnp.allclose(C, C_ref, atol=1e-2, rtol=1e-3), f"mismatch at N={N}"

    print("KERNEL_OK")
</pallas_src>

<mosaic_0001>
module attributes {stable_mosaic.version = 11 : i64} {
  func.func @_matmul_kernel(%arg0: i32, %arg1: i32, %arg2: i32, %arg3: memref<128x128xf32, #tpu.memory_space<vmem>>, %arg4: memref<128x128xf32, #tpu.memory_space<vmem>>, %arg5: memref<128x128xf32, #tpu.memory_space<vmem>>) attributes {dimension_semantics = [#tpu.dimension_semantics<parallel>, #tpu.dimension_semantics<parallel>, #tpu.dimension_semantics<arbitrary>], iteration_bounds = array<i64: 1, 1, 1>, scalar_prefetch = 0 : i64, scratch_operands = 0 : i64, tpu.core_type = #tpu.core_type<tc>, window_params = [{transform_indices = @transform_0, window_bounds = array<i64: 128, 128>}, {transform_indices = @transform_1, window_bounds = array<i64: 128, 128>}, {transform_indices = @transform_2, window_bounds = array<i64: 128, 128>}]} {
    %c0 = arith.constant 0 : index
    %c0_0 = arith.constant 0 : index
    %0 = vector.load %arg3[%c0, %c0_0] : memref<128x128xf32, #tpu.memory_space<vmem>>, vector<128x128xf32>
    %c0_1 = arith.constant 0 : index
    %c0_2 = arith.constant 0 : index
    %1 = vector.load %arg4[%c0_1, %c0_2] : memref<128x128xf32, #tpu.memory_space<vmem>>, vector<128x128xf32>
    %cst = arith.constant dense<0.000000e+00> : vector<128x128xf32>
    %2 = tpu.matmul %0, %1, %cst {dimension_numbers = #tpu.dot_dimension_numbers<[1], [0], [0], [1], [0, 0, 1, 1], [], []>, precision = #tpu.contract_precision<fp32>} : vector<128x128xf32>, vector<128x128xf32>, vector<128x128xf32> -> vector<128x128xf32>
    %c0_i32 = arith.constant 0 : i32
    %3 = arith.cmpi eq, %arg2, %c0_i32 : i32
    %4 = arith.extui %3 : i1 to i32
    %c0_i32_3 = arith.constant 0 : i32
    %5 = arith.cmpi ne, %4, %c0_i32_3 : i32
    scf.if %5 {
      %c0_6 = arith.constant 0 : index
      %c0_7 = arith.constant 0 : index
      %9 = vector.load %arg5[%c0_6, %c0_7] : memref<128x128xf32, #tpu.memory_space<vmem>>, vector<128x128xf32>
      tpu.vector_store %arg5[%c0_6, %c0_7], %2 {strides = array<i32>} : memref<128x128xf32, #tpu.memory_space<vmem>>, vector<128x128xf32>,
    } else {
    }
    %c0_i32_4 = arith.constant 0 : i32
    %6 = arith.cmpi ne, %arg2, %c0_i32_4 : i32
    %7 = arith.extui %6 : i1 to i32
    %c0_i32_5 = arith.constant 0 : i32
    %8 = arith.cmpi ne, %7, %c0_i32_5 : i32
    scf.if %8 {
      %c0_6 = arith.constant 0 : index
      %c0_7 = arith.constant 0 : index
      %9 = vector.load %arg5[%c0_6, %c0_7] : memref<128x128xf32, #tpu.memory_space<vmem>>, vector<128x128xf32>
      %10 = arith.addf %9, %2 : vector<128x128xf32>
      %c0_8 = arith.constant 0 : index
      %c0_9 = arith.constant 0 : index
      %11 = vector.load %arg5[%c0_8, %c0_9] : memref<128x128xf32, #tpu.memory_space<vmem>>, vector<128x128xf32>
      tpu.vector_store %arg5[%c0_8, %c0_9], %10 {strides = array<i32>} : memref<128x128xf32, #tpu.memory_space<vmem>>, vector<128x128xf32>,
    } else {
    }
    return
  }
  func.func @transform_0(%arg0: i32, %arg1: i32, %arg2: i32) -> (i32, i32) {
    %c0_i32 = arith.constant 0 : i32
    return %arg0, %arg2 : i32, i32
  }
  func.func @transform_1(%arg0: i32, %arg1: i32, %arg2: i32) -> (i32, i32) {
    %c0_i32 = arith.constant 0 : i32
    return %arg2, %arg1 : i32, i32
  }
  func.func @transform_2(%arg0: i32, %arg1: i32, %arg2: i32) -> (i32, i32) {
    %c0_i32 = arith.constant 0 : i32
    return %arg0, %arg1 : i32, i32
  }
}

</mosaic_0001>

<bundles_post_ra>
// kernel: tpu_custom_call.1
= control target key start
LH: loop header
LB: loop body
LE: loop exit
PB: predicated region body
PF: predicated region fallthrough
CT: control target
= control target key end

     0   :  { %7 = vsyncpa [#allocation3], 0  ;;  %s1682_s0 = inlined_call_operand.hbm [shape: f32[128,128], index: 0, kind: input, shape index: {}]   ;;  %s1683_s1 = inlined_call_operand.hbm [shape: f32[128,128], index: 1, kind: input, shape index: {}]   ;;  %s1684_s2 = inlined_call_operand.hbm [shape: f32[128,128], index: 2, kind: output, shape index: {}]  }
   0x1   :  { %8 = vsyncpa [#allocation6], 0 }
   0x2   :  { %9 = vsyncpa [#allocation4], 0  ;;  %s14_s11 = sshll.u32 %s1682_s0, 4  ;;  %s1089_s12 = smov [#allocation2]   ;;  %s15_s11 = int_to_ptr.hbm [resolvable:$true] %s14_s11 }
   0x3   :  { %s16_s13 = sshll.u32 %s1089_s12, 4  ;;  %s27_s16 = sshll.u32 %s1683_s1, 4  ;;  %s17_s13 = int_to_ptr.vmem [resolvable:$true] %s16_s13  ;;  %s28_s16 = int_to_ptr.hbm [resolvable:$true] %s27_s16 }
   0x4   :  { %s1090_s17 = smov 128   ;;  %s1091_s18 = smov 8  }
   0x5   :  { %22 = dma.hbm_to_vmem [thread:$0]  %s15_s11, 2048, %s17_s13, [#allocation3], %s1090_s17, %s1090_s17, %s1091_s18  }
   0x6   :  { %s1092_s19 = smov [#allocation5]  }
   0x7   :  { %s29_s20 = sshll.u32 %s1092_s19, 4  ;;  %s30_s20 = int_to_ptr.vmem [resolvable:$true] %s29_s20 }
   0x8   :  { %35 = dma.hbm_to_vmem [thread:$0]  %s28_s16, 2048, %s30_s20, [#allocation6], %s1090_s17, %s1090_s17, %s1091_s18  }
   0x9   :  { %1083 = dma.done.wait [#allocation3], 2048  }
   0xa   :  { %1084 = vsyncadd [#allocation3], 4294965248 }
   0xb   :  { %1085 = dma.done.wait [#allocation6], 2048  }
   0xc   :  { %1086 = vsyncadd [#allocation6], 4294965248  ;;  %v75_v0 = vld [vmem:[#allocation5 + $0x78] sm:$0xff]  ;;  %v74_v1 = vld [vmem:[#allocation5 + $0x70] sm:$0xff]  ;;  %s1093_s0 = smov [#allocation7]   ;;  %s960_s23 = sshll.u32 %s1684_s2, 4  ;;  %s961_s23 = int_to_ptr.hbm [resolvable:$true] %s960_s23 }
   0xd   :  { %v73_v2 = vld [vmem:[#allocation5 + $0x68] sm:$0xff]  ;;  %v1121_v3 = vand.u32 4294901760, %v75_v0  ;;  %v1123_v4 = vand.u32 4294901760, %v74_v1  ;;  %v72_v6 = vld [vmem:[#allocation5 + $0x60] sm:$0xff]  ;;  %v71_v7 = vld [vmem:[#allocation5 + $0x58] sm:$0xff]  ;;  %s958_s1 = sshll.u32 %s1093_s0, 4  ;;  %s959_s1 = int_to_ptr.vmem [resolvable:$true] %s958_s1 }
   0xe   :  { %v1125_v5 = vand.u32 4294901760, %v73_v2  ;;  %v70_v8 = vld [vmem:[#allocation5 + $0x50] sm:$0xff]  ;;  %v1127_v9 = vand.u32 4294901760, %v72_v6  ;;  %v1129_v10 = vand.u32 4294901760, %v71_v7  ;;  %v69_v12 = vld [vmem:[#allocation5 + $0x48] sm:$0xff]  ;;  %v68_v13 = vld [vmem:[#allocation5 + $0x40] sm:$0xff] }
   0xf   :  { %v1131_v11 = vand.u32 4294901760, %v70_v8  ;;  %974 = vmatpush.msra.mxu2 %v1121_v3  ;;  %v1135_v14 = vsub.f32 %v75_v0, %v1121_v3  ;;  %v1138_v15 = vsub.f32 %v74_v1, %v1123_v4  ;;  %77 = vmatpush.msra.mxu0 %v1121_v3  ;;  %v67_v17 = vld [vmem:[#allocation5 + $0x38] sm:$0xff]  ;;  %v1144_v18 = vand.u32 4294901760, %v69_v12  ;;  %v66_v25 = vld [vmem:[#allocation5 + $0x30] sm:$0xff]  ;;  %v65_v33 = vld [vmem:[#allocation5 + $0x28] sm:$0xff] }
  0x10   :  { %v1141_v16 = vsub.f32 %v73_v2, %v1125_v5  ;;  %v1147_v19 = vsub.f32 %v72_v6, %v1127_v9  ;;  %v1150_v20 = vsub.f32 %v71_v7, %v1129_v10  ;;  %v1156_v24 = vand.u32 4294901760, %v68_v13  ;;  %v64_v42 = vld [vmem:[#allocation5 + $0x20] sm:$0xff]  ;;  %v63_v49 = vld [vmem:[#allocation5 + $0x18] sm:$0xff]  ;;  %v62_v55 = vld [vmem:[#allocation5 + $0x10] sm:$0xff] }
  0x11   :  { %975 = vmatpush.msra.mxu2 %v1123_v4  ;;  %v239_v21 = vand.u32 4294901760, %v1135_v14  ;;  %v245_v22 = vand.u32 4294901760, %v1138_v15  ;;  %79 = vmatpush.msra.mxu0 %v1123_v4  ;;  %v1160_v27 = vand.u32 4294901760, %v67_v17  ;;  %v1163_v28 = vsub.f32 %v70_v8, %v1131_v11  ;;  %v52_v47 = vld [vmem:[#allocation2 + $0x40] sm:$0xff]  ;;  %v61_v62 = vld [vmem:[#allocation5 + $0x8] sm:$0xff] }
  0x12   :  { %v251_v23 = vand.u32 4294901760, %v1141_v16  ;;  %v257_v26 = vand.u32 4294901760, %v1147_v19  ;;  %v263_v32 = vand.u32 4294901760, %v1150_v20  ;;  %v1180_v35 = vand.u32 4294901760, %v66_v25  ;;  %v60_v2 = vld [vmem:[#allocation5] sm:$0xff] }
  0x13   :  { %976 = vmatpush.msra.mxu2 %v1125_v5  ;;  %v240_v29 = vsub.f32 %v1135_v14, %v239_v21  ;;  %v246_v30 = vsub.f32 %v1138_v15, %v245_v22  ;;  %81 = vmatpush.msra.mxu0 %v1125_v5  ;;  %v1183_v36 = vsub.f32 %v69_v12, %v1144_v18  ;;  %v1696_v39 = vand.u32 4294901760, %v1163_v28  ;;  %v44_v12 = vld [vmem:[#allocation2] sm:$0xff] }
  0x14   :  { %v252_v31 = vsub.f32 %v1141_v16, %v251_v23  ;;  %v258_v34 = vsub.f32 %v1147_v19, %v257_v26  ;;  %v1189_v40 = vsub.f32 %v68_v13, %v1156_v24  ;;  %v1191_v41 = vand.u32 4294901760, %v65_v33 }
  0x15   :  { %977 = vmatpush.msra.mxu2 %v1127_v9  ;;  %v241_v37 = vand.u32 4294901760, %v240_v29  ;;  %v247_v38 = vand.u32 4294901760, %v246_v30  ;;  %83 = vmatpush.msra.mxu0 %v1127_v9  ;;  %v264_v44 = vsub.f32 %v1150_v20, %v263_v32  ;;  %v1695_v45 = vand.u32 4294901760, %v1183_v36  ;;  %v53_v30 = vld [vmem:[#allocation2 + $0x48] sm:$0xff] }
  0x16   :  { %v253_v43 = vand.u32 4294901760, %v252_v31  ;;  %v1199_v46 = vsub.f32 %v67_v17, %v1160_v27  ;;  %v1692_v48 = vand.u32 4294901760, %v1189_v40  ;;  %v259_v50 = vand.u32 4294901760, %v258_v34 }
  0x17   :  { %978 = vmatpush.msra.mxu2 %v1129_v10  ;;  %990 = vmatpush.msra.mxu3 %v241_v37  ;;  %v270_v51 = vsub.f32 %v1163_v28, %v1696_v39  ;;  %v1207_v52 = vand.u32 4294901760, %v64_v42  ;;  %v1210_v53 = vsub.f32 %v66_v25, %v1180_v35  ;;  %v1214_v56 = vand.u32 4294901760, %v52_v47 }
  0x18   :  { %242 = vmatpush.msra.mxu1 %v241_v37  ;;  %85 = vmatpush.msra.mxu0 %v1129_v10  ;;  %v1689_v54 = vand.u32 4294901760, %v1199_v46  ;;  %v265_v57 = vand.u32 4294901760, %v264_v44  ;;  %v276_v58 = vsub.f32 %v1183_v36, %v1695_v45  ;;  %v1220_v59 = vand.u32 4294901760, %v63_v49  ;;  %v55_v45 = vld [vmem:[#allocation2 + $0x58] sm:$0xff] }
  0x19   :  { %979 = vmatpush.msra.mxu2 %v1131_v11  ;;  %991 = vmatpush.msra.mxu3 %v247_v38  ;;  %v1223_v60 = vsub.f32 %v65_v33, %v1191_v41  ;;  %v282_v61 = vsub.f32 %v1189_v40, %v1692_v48  ;;  %v271_v63 = vand.u32 4294901760, %v270_v51  ;;  %v1230_v0 = vand.u32 4294901760, %v62_v55 }
  0x1a   :  { %248 = vmatpush.msra.mxu1 %v247_v38  ;;  %87 = vmatpush.msra.mxu0 %v1131_v11  ;;  %v1688_v1 = vand.u32 4294901760, %v1210_v53  ;;  %v1234_v6 = vsub.f32 %v64_v42, %v1207_v52  ;;  %v288_v7 = vsub.f32 %v1199_v46, %v1689_v54  ;;  %v1241_v8 = vsub.f32 %v52_v47, %v1214_v56 }
  0x1b   :  { %980 = vmatpush.msra.mxu2 %v1144_v18  ;;  %992 = vmatpush.msra.mxu3 %v253_v43  ;;  %v277_v13 = vand.u32 4294901760, %v276_v58  ;;  %v1244_v17 = vand.u32 4294901760, %v61_v62  ;;  %v1685_v25 = vand.u32 4294901760, %v1223_v60  ;;  %v1248_v29 = vsub.f32 %v63_v49, %v1220_v59 }
  0x1c   :  { %254 = vmatpush.msra.mxu1 %v253_v43  ;;  %89 = vmatpush.msra.mxu0 %v1144_v18  ;;  %v283_v31 = vand.u32 4294901760, %v282_v61  ;;  %v1250_v33 = vand.u32 4294901760, %v60_v2  ;;  %v294_v34 = vsub.f32 %v1210_v53, %v1688_v1  ;;  %v1687_v37 = vand.u32 4294901760, %v1234_v6 }
  0x1d   :  { %981 = vmatpush.msra.mxu2 %v1156_v24  ;;  %993 = vmatpush.msra.mxu3 %v259_v50  ;;  %v1259_v38 = vsub.f32 %v62_v55, %v1230_v0  ;;  %v1261_v42 = vand.u32 4294901760, %v44_v12  ;;  %v289_v43 = vand.u32 4294901760, %v288_v7  ;;  %v1686_v44 = vand.u32 4294901760, %v1241_v8 }
  0x1e   :  { %260 = vmatpush.msra.mxu1 %v259_v50  ;;  %91 = vmatpush.msra.mxu0 %v1156_v24  ;;  %v1265_v47 = vand.u32 4294901760, %v53_v30  ;;  %v300_v49 = vsub.f32 %v1223_v60, %v1685_v25  ;;  %v1690_v50 = vand.u32 4294901760, %v1248_v29  ;;  %v1273_v51 = vsub.f32 %v61_v62, %v1244_v17 }
  0x1f   :  { %982 = vmatpush.msra.mxu2 %v1160_v27  ;;  %994 = vmatpush.msra.mxu3 %v265_v57  ;;  %v1276_v55 = vsub.f32 %v44_v12, %v1261_v42  ;;  %v295_v58 = vand.u32 4294901760, %v294_v34  ;;  %v306_v61 = vsub.f32 %v1234_v6, %v1687_v37  ;;  %v1285_v62 = vsub.f32 %v60_v2, %v1250_v33  ;;  %v54_v34 = vld [vmem:[#allocation2 + $0x50] sm:$0xff] }
  0x20   :  { %266 = vmatpush.msra.mxu1 %v265_v57  ;;  %93 = vmatpush.msra.mxu0 %v1160_v27  ;;  %v45_v57 = vld [vmem:[#allocation2 + $0x8] sm:$0xff]  ;;  %v175_v7 = vsub.f32 %v1241_v8, %v1686_v44  ;;  %v1292_v12 = vsub.f32 %v53_v30, %v1265_v47  ;;  %v301_v2 = vand.u32 4294901760, %v300_v49  ;;  %v1694_v44 = vand.u32 4294901760, %v1273_v51 }
  0x21   :  { %983 = vmatpush.msra.mxu2 %v1180_v35  ;;  %995 = vmatpush.msra.mxu3 %v271_v63  ;;  %v1295_v25 = vand.u32 4294901760, %v45_v57  ;;  %v307_v30 = vand.u32 4294901760, %v306_v61  ;;  %v329_v1 = vand.u32 4294901760, %v1285_v62  ;;  %v1308_v49 = vand.u32 4294901760, %v54_v34 }
  0x22   :  { %272 = vmatpush.msra.mxu1 %v271_v63  ;;  %95 = vmatpush.msra.mxu0 %v1180_v35  ;;  %v1691_v63 = vand.u32 4294901760, %v1259_v38  ;;  %v176_v54 = vand.u32 4294901760, %v175_v7  ;;  %v324_v7 = vsub.f32 %v1273_v51, %v1694_v44 }
  0x23   :  { %984 = vmatpush.msra.mxu2 %v1191_v41  ;;  %996 = vmatpush.msra.mxu3 %v277_v13  ;;  %v1316_v61 = vsub.f32 %v45_v57, %v1295_v25  ;;  %v330_v57 = vsub.f32 %v1285_v62, %v329_v1 }
  0x24   :  { %278 = vmatpush.msra.mxu1 %v277_v13  ;;  %97 = vmatpush.msra.mxu0 %v1191_v41  ;;  %v1693_v13 = vand.u32 4294901760, %v1276_v55  ;;  %v318_v37 = vsub.f32 %v1259_v38, %v1691_v63 }
  0x25   :  { %985 = vmatpush.msra.mxu2 %v1207_v52  ;;  %997 = vmatpush.msra.mxu3 %v283_v31  ;;  %v118_v44 = vand.u32 4294901760, %v1316_v61 }
  0x26   :  { %284 = vmatpush.msra.mxu1 %v283_v31  ;;  %99 = vmatpush.msra.mxu0 %v1207_v52  ;;  %v312_v31 = vsub.f32 %v1248_v29, %v1690_v50  ;;  %v1697_v50 = vand.u32 4294901760, %v1292_v12  ;;  %v319_v48 = vand.u32 4294901760, %v318_v37  ;;  %v325_v37 = vand.u32 4294901760, %v324_v7 }
  0x27   :  { %986 = vmatpush.msra.mxu2 %v1220_v59  ;;  %998 = vmatpush.msra.mxu3 %v289_v43  ;;  %v119_v7 = vsub.f32 %v1316_v61, %v118_v44 }
  0x28   :  { %290 = vmatpush.msra.mxu1 %v289_v43  ;;  %101 = vmatpush.msra.mxu0 %v1220_v59  ;;  %v111_v43 = vsub.f32 %v1276_v55, %v1693_v13  ;;  %v313_v63 = vand.u32 4294901760, %v312_v31  ;;  %v1328_v13 = vsub.f32 %v54_v34, %v1308_v49  ;;  %v183_v31 = vsub.f32 %v1292_v12, %v1697_v50 }
  0x29   :  { %987 = vmatpush.msra.mxu2 %v1230_v0  ;;  %999 = vmatpush.msra.mxu3 %v295_v58  ;;  %v1339_v34 = vand.u32 4294901760, %v55_v45 }
  0x2a   :  { %296 = vmatpush.msra.mxu1 %v295_v58  ;;  %103 = vmatpush.msra.mxu0 %v1230_v0  ;;  %v46_v58 = vld [vmem:[#allocation2 + $0x10] sm:$0xff] }
  0x2b   :  { %988 = vmatpush.msra.mxu2 %v1244_v17  ;;  %1000 = vmatpush.msra.mxu3 %v301_v2  ;;  %v1334_v39 = vand.u32 4294901760, %v46_v58 }
  0x2c   :  { %302 = vmatpush.msra.mxu1 %v301_v2  ;;  %105 = vmatpush.msra.mxu0 %v1244_v17  ;;  %v112_v2 = vand.u32 4294901760, %v111_v43  ;;  %v190_v43 = vand.u32 4294901760, %v1328_v13 }
  0x2d   :  { %989 = vmatpush.msra.mxu2 %v1250_v33  ;;  %1001 = vmatpush.msra.mxu3 %v307_v30  ;;  %v1346_v50 = vsub.f32 %v46_v58, %v1334_v39 }
  0x2e   :  { %177 = vmatmul.f32.vlgmr.msra.gmra.mxu2 %v176_v54  ;;  %308 = vmatpush.msra.mxu1 %v307_v30  ;;  %v331_v54 = vand.u32 4294901760, %v330_v57  ;;  %v184_v30 = vand.u32 4294901760, %v183_v31  ;;  %v191_v58 = vsub.f32 %v1328_v13, %v190_v43  ;;  %v120_v57 = vand.u32 4294901760, %v119_v7 }
  0x2f   :  { %1002 = vmatpush.msra.mxu3 %v313_v63  ;;  %400 = vmatpush.msrb.mxu2 %v1135_v14  ;;  %v126_v31 = vand.u32 4294901760, %v1346_v50 }
  0x30   :  { %314 = vmatpush.msra.mxu1 %v313_v63  ;;  %107 = vmatpush.msra.mxu0 %v1250_v33  ;;  %v47_v63 = vld [vmem:[#allocation2 + $0x18] sm:$0xff] }
  0x31   :  { %1003 = vmatpush.msra.mxu3 %v319_v48  ;;  %403 = vmatpush.msrb.mxu2 %v1138_v15 }
  0x32   :  { %320 = vmatpush.msra.mxu1 %v319_v48  ;;  %113 = vmatmul.f32.vlgmr.msra.gmra.mxu0 %v112_v2  ;;  %v1353_v48 = vsub.f32 %v55_v45, %v1339_v34  ;;  %v56_v2 = vld [vmem:[#allocation2 + $0x60] sm:$0xff] }
  0x33   :  { %1004 = vmatpush.msra.mxu3 %v325_v37  ;;  %406 = vmatpush.msrb.mxu2 %v1141_v16  ;;  %v1368_v14 = vand.u32 4294901760, %v56_v2 }
  0x34   :  { %326 = vmatpush.msra.mxu1 %v325_v37  ;;  %659 = vmatpush.msrb.mxu0 %v239_v21  ;;  %v1360_v37 = vand.u32 4294901760, %v47_v63  ;;  %v192_v21 = vand.u32 4294901760, %v191_v58  ;;  %v198_v45 = vand.u32 4294901760, %v1353_v48 }
  0x35   :  { %1005 = vmatpush.msra.mxu3 %v331_v54  ;;  %409 = vmatpush.msrb.mxu2 %v1147_v19  ;;  %v1386_v15 = vsub.f32 %v56_v2, %v1368_v14  ;;  %v1698_v2 = vand.u32 4294901760, %v1163_v28 }
  0x36   :  { %185 = vmatmul.f32.gmra.mxu2 %v184_v30  ;;  %366 = vmatmul.f32.vlgmr.msra.gmra.mxu3 %v1214_v56  ;;  %v1376_v30 = vsub.f32 %v47_v63, %v1360_v37 }
  0x37   :  { %528 = vmatpush.msrb.mxu3 %v1121_v3  ;;  %332 = vmatpush.msra.mxu1 %v331_v54  ;;  %v127_v54 = vsub.f32 %v1346_v50, %v126_v31  ;;  %v206_v7 = vand.u32 4294901760, %v1386_v15 }
  0x38   :  { %334 = vmatmul.f32.vlgmr.msra.gmra.mxu1 %v1261_v42  ;;  %663 = vmatpush.msrb.mxu0 %v245_v22  ;;  %v134_v16 = vand.u32 4294901760, %v1376_v30 }
  0x39   :  { %530 = vmatpush.msrb.mxu3 %v1123_v4  ;;  %786 = vmatpush.msrb.mxu1 %v1121_v3  ;;  %v48_v3 = vld [vmem:[#allocation2 + $0x20] sm:$0xff]  ;;  %v128_v22 = vand.u32 4294901760, %v127_v54 }
  0x3a   :  { %412 = vmatpush.msrb.mxu2 %v1150_v20  ;;  %121 = vmatmul.f32.gmra.mxu0 %v120_v57  ;;  %v135_v19 = vsub.f32 %v1376_v30, %v134_v16  ;;  %v207_v57 = vsub.f32 %v1386_v15, %v206_v7 }
  0x3b   :  { %532 = vmatpush.msrb.mxu3 %v1125_v5  ;;  %788 = vmatpush.msrb.mxu1 %v1123_v4  ;;  %v199_v4 = vsub.f32 %v1353_v48, %v198_v45 }
  0x3c   :  { %667 = vmatpush.msrb.mxu0 %v251_v23  ;;  %415 = vmatpush.msrb.mxu2 %v1163_v28  ;;  %v1393_v23 = vand.u32 4294901760, %v48_v3  ;;  %v1699_v28 = vand.u32 4294901760, %v1183_v36 }
  0x3d   :  { %534 = vmatpush.msrb.mxu3 %v1127_v9  ;;  %790 = vmatpush.msrb.mxu1 %v1125_v5  ;;  %v57_v5 = vld [vmem:[#allocation2 + $0x68] sm:$0xff]  ;;  %v200_v63 = vand.u32 4294901760, %v199_v4  ;;  %v208_v4 = vand.u32 4294901760, %v207_v57 }
  0x3e   :  { %193 = vmatmul.f32.gmra.mxu2 %v192_v21  ;;  %370 = vmatmul.f32.gmra.mxu3 %v1265_v47  ;;  %v1410_v58 = vsub.f32 %v48_v3, %v1393_v23  ;;  %v136_v21 = vand.u32 4294901760, %v135_v19  ;;  %v1701_v19 = vand.u32 4294901760, %v1199_v46 }
  0x3f   :  { %536 = vmatpush.msrb.mxu3 %v1129_v10  ;;  %671 = vmatpush.msrb.mxu0 %v257_v26  ;;  %v1407_v26 = vand.u32 4294901760, %v57_v5 }
  0x40   :  { %338 = vmatmul.f32.gmra.mxu1 %v1295_v25  ;;  %418 = vmatpush.msrb.mxu2 %v1183_v36  ;;  %v1700_v36 = vand.u32 4294901760, %v1189_v40 }
  0x41   :  { %538 = vmatpush.msrb.mxu3 %v1131_v11  ;;  %792 = vmatpush.msrb.mxu1 %v1127_v9  ;;  %v49_v9 = vld [vmem:[#allocation2 + $0x28] sm:$0xff]  ;;  %v1425_v20 = vsub.f32 %v57_v5, %v1407_v26 }
  0x42   :  { %129 = vmatmul.f32.gmra.mxu0 %v128_v22  ;;  %421 = vmatpush.msrb.mxu2 %v1189_v40  ;;  %v1428_v54 = vand.u32 4294901760, %v49_v9 }
  0x43   :  { %540 = vmatpush.msrb.mxu3 %v1144_v18  ;;  %675 = vmatpush.msrb.mxu0 %v263_v32  ;;  %v58_v32 = vld [vmem:[#allocation2 + $0x70] sm:$0xff]  ;;  %v214_v22 = vand.u32 4294901760, %v1425_v20 }
  0x44   :  { %794 = vmatpush.msrb.mxu1 %v1129_v10  ;;  %424 = vmatpush.msrb.mxu2 %v1199_v46  ;;  %v142_v10 = vand.u32 4294901760, %v1410_v58  ;;  %v1437_v3 = vand.u32 4294901760, %v58_v32  ;;  %v1445_v5 = vsub.f32 %v49_v9, %v1428_v54  ;;  %v59_v46 = vld [vmem:[#allocation2 + $0x78] sm:$0xff] }
  0x45   :  { %542 = vmatpush.msrb.mxu3 %v1156_v24  ;;  %679 = vmatpush.msrb.mxu0 %v1698_v2  ;;  %v215_v40 = vsub.f32 %v1425_v20, %v214_v22  ;;  %v1702_v2 = vand.u32 4294901760, %v1210_v53 }
  0x46   :  { %201 = vmatmul.f32.gmra.mxu2 %v200_v63  ;;  %374 = vmatmul.f32.gmra.mxu3 %v1308_v49  ;;  %v1453_v63 = vsub.f32 %v58_v32, %v1437_v3 }
  0x47   :  { %796 = vmatpush.msrb.mxu1 %v1131_v11  ;;  %544 = vmatpush.msrb.mxu3 %v1160_v27  ;;  %v143_v11 = vsub.f32 %v1410_v58, %v142_v10  ;;  %v216_v32 = vand.u32 4294901760, %v215_v40 }
  0x48   :  { %342 = vmatmul.f32.gmra.mxu1 %v1334_v39  ;;  %683 = vmatpush.msrb.mxu0 %v1699_v28  ;;  %v1476_v28 = vand.u32 4294901760, %v59_v46 }
  0x49   :  { %427 = vmatpush.msrb.mxu2 %v1210_v53  ;;  %798 = vmatpush.msrb.mxu1 %v1144_v18  ;;  %v50_v18 = vld [vmem:[#allocation2 + $0x30] sm:$0xff]  ;;  %v144_v9 = vand.u32 4294901760, %v143_v11  ;;  %v1703_v53 = vand.u32 4294901760, %v1223_v60  ;;  %v51_v11 = vld [vmem:[#allocation2 + $0x38] sm:$0xff] }
  0x4a   :  { %137 = vmatmul.f32.gmra.mxu0 %v136_v21  ;;  %546 = vmatpush.msrb.mxu3 %v1180_v35  ;;  %v1463_v57 = vand.u32 4294901760, %v50_v18  ;;  %v222_v21 = vand.u32 4294901760, %v1453_v63 }
  0x4b   :  { %687 = vmatpush.msrb.mxu0 %v1700_v36  ;;  %430 = vmatpush.msrb.mxu2 %v1223_v60  ;;  %v1704_v36 = vand.u32 4294901760, %v1234_v6 }
  0x4c   :  { %800 = vmatpush.msrb.mxu1 %v1156_v24  ;;  %548 = vmatpush.msrb.mxu3 %v1191_v41  ;;  %v150_v24 = vand.u32 4294901760, %v1445_v5 }
  0x4d   :  { %691 = vmatpush.msrb.mxu0 %v1701_v19  ;;  %433 = vmatpush.msrb.mxu2 %v1234_v6  ;;  %v1498_v19 = vand.u32 4294901760, %v51_v11  ;;  %v1705_v6 = vand.u32 4294901760, %v1248_v29 }
  0x4e   :  { %209 = vmatmul.f32.gmra.mxu2 %v208_v4  ;;  %378 = vmatmul.f32.gmra.mxu3 %v1339_v34  ;;  %v1480_v4 = vsub.f32 %v50_v18, %v1463_v57  ;;  %v1495_v18 = vsub.f32 %v59_v46, %v1476_v28 }
  0x4f   :  { %802 = vmatpush.msrb.mxu1 %v1160_v27  ;;  %550 = vmatpush.msrb.mxu3 %v1207_v52  ;;  %v151_v27 = vsub.f32 %v1445_v5, %v150_v24 }
  0x50   :  { %346 = vmatmul.f32.gmra.mxu1 %v1360_v37  ;;  %695 = vmatpush.msrb.mxu0 %v1702_v2  ;;  %v1706_v2 = vand.u32 4294901760, %v1259_v38 }
  0x51   :  { %436 = vmatpush.msrb.mxu2 %v1248_v29  ;;  %804 = vmatpush.msrb.mxu1 %v1180_v35  ;;  %v223_v35 = vsub.f32 %v1453_v63, %v222_v21  ;;  %v152_v60 = vand.u32 4294901760, %v151_v27  ;;  %v1707_v29 = vand.u32 4294901760, %v1273_v51 }
  0x52   :  { %145 = vmatmul.f32.gmra.mxu0 %v144_v9  ;;  %552 = vmatpush.msrb.mxu3 %v1220_v59  ;;  %v230_v9 = vand.u32 4294901760, %v1495_v18 }
  0x53   :  { %699 = vmatpush.msrb.mxu0 %v1703_v53  ;;  %439 = vmatpush.msrb.mxu2 %v1259_v38  ;;  %v224_v40 = vand.u32 4294901760, %v223_v35 }
  0x54   :  { %806 = vmatpush.msrb.mxu1 %v1191_v41  ;;  %554 = vmatpush.msrb.mxu3 %v1230_v0  ;;  %v158_v41 = vand.u32 4294901760, %v1480_v4 }
  0x55   :  { %703 = vmatpush.msrb.mxu0 %v1704_v36  ;;  %442 = vmatpush.msrb.mxu2 %v1273_v51 }
  0x56   :  { %217 = vmatmul.f32.gmra.mxu2 %v216_v32  ;;  %382 = vmatmul.f32.gmra.mxu3 %v1368_v14  ;;  %v159_v46 = vsub.f32 %v1480_v4, %v158_v41 }
  0x57   :  { %808 = vmatpush.msrb.mxu1 %v1207_v52  ;;  %445 = vmatpush.msrb.mxu2 %v1285_v62  ;;  %v165_v52 = vsub.f32 %v51_v11, %v1498_v19 }
  0x58   :  { %350 = vmatmul.f32.gmra.mxu1 %v1393_v23  ;;  %556 = vmatpush.msrb.mxu3 %v1244_v17  ;;  %v160_v32 = vand.u32 4294901760, %v159_v46 }
  0x59   :  { %707 = vmatpush.msrb.mxu0 %v1705_v6  ;;  %810 = vmatpush.msrb.mxu1 %v1220_v59  ;;  %v231_v59 = vsub.f32 %v1495_v18, %v230_v9  ;;  %v166_v27 = vand.u32 4294901760, %v165_v52 }
  0x5a   :  { %153 = vmatmul.f32.gmra.mxu0 %v152_v60  ;;  %558 = vmatpush.msrb.mxu3 %v1250_v33 }
  0x5b   :  { %711 = vmatpush.msrb.mxu0 %v1706_v2  ;;  %812 = vmatpush.msrb.mxu1 %v1230_v0  ;;  %v232_v0 = vand.u32 4294901760, %v231_v59  ;;  %v167_v38 = vsub.f32 %v165_v52, %v166_v27 }
  0x5d   :  { %715 = vmatpush.msrb.mxu0 %v1707_v29  ;;  %814 = vmatpush.msrb.mxu1 %v1244_v17  ;;  %v168_v17 = vand.u32 4294901760, %v167_v38 }
  0x5e   :  { %225 = vmatmul.f32.gmra.mxu2 %v224_v40  ;;  %386 = vmatmul.f32.gmra.mxu3 %v1407_v26 }
  0x5f   :  { %719 = vmatpush.msrb.mxu0 %v329_v1  ;;  %816 = vmatpush.msrb.mxu1 %v1250_v33  ;;  %v1708_v1 = vand.u32 4294901760, %v1276_v55 }
  0x60   :  { %354 = vmatmul.f32.gmra.mxu1 %v1428_v54 }
  0x62   :  { %161 = vmatmul.f32.gmra.mxu0 %v160_v32 }
  0x66   :  { %233 = vmatmul.f32.gmra.mxu2 %v232_v0  ;;  %390 = vmatmul.f32.gmra.mxu3 %v1437_v3 }
  0x68   :  { %358 = vmatmul.f32.gmra.mxu1 %v1463_v57 }
  0x6a   :  { %169 = vmatmul.f32.gmra.mxu0 %v168_v17 }
  0x6e   :  { %394 = vmatmul.f32.gmra.mxu3 %v1476_v28  ;;  %448 = vmatmul.f32.vlgmr.msrb.gmra.mxu2 %v1276_v55 }
  0x70   :  { %362 = vmatmul.f32.gmra.mxu1 %v1498_v19 }
  0x72   :  { %721 = vmatmul.f32.vlgmr.msrb.gmra.mxu0 %v1261_v42 }
  0x76   :  { %453 = vmatmul.f32.gmra.mxu2 %v1316_v61  ;;  %562 = vmatmul.f32.vlgmr.msrb.gmra.mxu3 %v1708_v1  ;;  %v1710_v61 = vand.u32 4294901760, %v1292_v12 }
  0x78   :  { %818 = vmatmul.f32.vlgmr.msrb.gmra.mxu1 %v1261_v42  ;;  %v1709_v42 = vand.u32 4294901760, %v1241_v8 }
  0x7a   :  { %725 = vmatmul.f32.gmra.mxu0 %v1295_v25 }
  0x7e   :  { %458 = vmatmul.f32.gmra.mxu2 %v1346_v50  ;;  %568 = vmatmul.f32.gmra.mxu3 %v118_v44 }
  0x80   :  { %822 = vmatmul.f32.gmra.mxu1 %v1295_v25 }
  0x82   :  { %729 = vmatmul.f32.gmra.mxu0 %v1334_v39 }
  0x86   :  { %463 = vmatmul.f32.gmra.mxu2 %v1376_v30  ;;  %574 = vmatmul.f32.gmra.mxu3 %v126_v31 }
  0x88   :  { %826 = vmatmul.f32.gmra.mxu1 %v1334_v39 }
  0x8a   :  { %733 = vmatmul.f32.gmra.mxu0 %v1360_v37 }
  0x8e   :  { %468 = vmatmul.f32.gmra.mxu2 %v1410_v58  ;;  %580 = vmatmul.f32.gmra.mxu3 %v134_v16 }
  0x90   :  { %830 = vmatmul.f32.gmra.mxu1 %v1360_v37 }
  0x92   :  { %737 = vmatmul.f32.gmra.mxu0 %v1393_v23 }
  0x96   :  { %473 = vmatmul.f32.gmra.mxu2 %v1445_v5  ;;  %586 = vmatmul.f32.gmra.mxu3 %v142_v10 }
  0x98   :  { %834 = vmatmul.f32.gmra.mxu1 %v1393_v23 }
  0x9a   :  { %741 = vmatmul.f32.gmra.mxu0 %v1428_v54 }
  0x9e   :  { %478 = vmatmul.f32.gmra.mxu2 %v1480_v4  ;;  %592 = vmatmul.f32.gmra.mxu3 %v150_v24 }
  0xa0   :  { %838 = vmatmul.f32.gmra.mxu1 %v1428_v54 }
  0xa2   :  { %745 = vmatmul.f32.gmra.mxu0 %v1463_v57 }
  0xa6   :  { %483 = vmatmul.f32.gmra.mxu2 %v165_v52  ;;  %598 = vmatmul.f32.gmra.mxu3 %v158_v41 }
  0xa8   :  { %842 = vmatmul.f32.gmra.mxu1 %v1463_v57 }
  0xaa   :  { %749 = vmatmul.f32.gmra.mxu0 %v1498_v19 }
  0xae   :  { %488 = vmatmul.f32.gmra.mxu2 %v1241_v8  ;;  %604 = vmatmul.f32.gmra.mxu3 %v166_v27 }
  0xaf   :  { %v1564_v39 = vpop.f32.mrf.mxu0 }
  0xb0   :  { %846 = vmatmul.f32.gmra.mxu1 %v1498_v19 }
  0xb1   :  { %v178_v25 = vpop.f32.mrf.mxu2 }
  0xb2   :  { %753 = vmatmul.f32.gmra.mxu0 %v1214_v56 }
  0xb5   :  { %v1568_v33 = vpop.f32.mrf.mxu1 }
  0xb6   :  { %493 = vmatmul.f32.gmra.mxu2 %v1292_v12  ;;  %610 = vmatmul.f32.gmra.mxu3 %v1709_v42 }
  0xb7   :  { %v1573_v44 = vpop.f32.mrf.mxu0 }
  0xb8   :  { %850 = vmatmul.f32.gmra.mxu1 %v1214_v56 }
  0xb9   :  { %v186_v50 = vpop.f32.mrf.mxu2  ;;  %v367_v51 = vpop.f32.mrf.mxu3 }
  0xba   :  { %v1576_v55 = vadd.f32 %v367_v51, %v178_v25  ;;  %757 = vmatmul.f32.gmra.mxu0 %v1265_v47 }
  0xbd   :  { %v1579_v62 = vpop.f32.mrf.mxu1 }
  0xbe   :  { %498 = vmatmul.f32.gmra.mxu2 %v1328_v13  ;;  %616 = vmatmul.f32.gmra.mxu3 %v1710_v61 }
  0xbf   :  { %v1584_v31 = vpop.f32.mrf.mxu0 }
  0xc0   :  { %854 = vmatmul.f32.gmra.mxu1 %v1265_v47 }
  0xc1   :  { %v194_v8 = vpop.f32.mrf.mxu2  ;;  %v371_v37 = vpop.f32.mrf.mxu3 }
  0xc2   :  { %v1587_v56 = vadd.f32 %v371_v37, %v186_v50  ;;  %761 = vmatmul.f32.gmra.mxu0 %v1308_v49 }
  0xc5   :  { %v1590_v30 = vpop.f32.mrf.mxu1 }
  0xc6   :  { %503 = vmatmul.f32.gmra.mxu2 %v1353_v48  ;;  %622 = vmatmul.f32.gmra.mxu3 %v190_v43  ;;  %v344_v17 = vadd.f32 %v1590_v30, %v1584_v31 }
  0xc7   :  { %v1595_v16 = vpop.f32.mrf.mxu0 }
  0xc8   :  { %858 = vmatmul.f32.gmra.mxu1 %v1308_v49 }
  0xc9   :  { %v202_v12 = vpop.f32.mrf.mxu2  ;;  %v375_v23 = vpop.f32.mrf.mxu3 }
  0xca   :  { %v1598_v47 = vadd.f32 %v375_v23, %v194_v8  ;;  %765 = vmatmul.f32.gmra.mxu0 %v1339_v34 }
  0xcd   :  { %v1601_v58 = vpop.f32.mrf.mxu1 }
  0xce   :  { %508 = vmatmul.f32.gmra.mxu2 %v1386_v15  ;;  %628 = vmatmul.f32.gmra.mxu3 %v198_v45 }
  0xcf   :  { %v1606_v10 = vpop.f32.mrf.mxu0 }
  0xd0   :  { %862 = vmatmul.f32.gmra.mxu1 %v1339_v34 }
  0xd1   :  { %v210_v13 = vpop.f32.mrf.mxu2  ;;  %v379_v43 = vpop.f32.mrf.mxu3 }
  0xd2   :  { %v1609_v49 = vadd.f32 %v379_v43, %v202_v12  ;;  %769 = vmatmul.f32.gmra.mxu0 %v1368_v14 }
  0xd5   :  { %v1612_v54 = vpop.f32.mrf.mxu1 }
  0xd6   :  { %513 = vmatmul.f32.gmra.mxu2 %v1425_v20  ;;  %634 = vmatmul.f32.gmra.mxu3 %v206_v7  ;;  %v352_v43 = vadd.f32 %v1612_v54, %v1606_v10 }
  0xd7   :  { %v1617_v5 = vpop.f32.mrf.mxu0 }
  0xd8   :  { %866 = vmatmul.f32.gmra.mxu1 %v1368_v14 }
  0xd9   :  { %v218_v48 = vpop.f32.mrf.mxu2  ;;  %v383_v45 = vpop.f32.mrf.mxu3 }
  0xda   :  { %v1620_v34 = vadd.f32 %v383_v45, %v210_v13  ;;  %773 = vmatmul.f32.gmra.mxu0 %v1407_v26 }
  0xdd   :  { %v1623_v24 = vpop.f32.mrf.mxu1 }
  0xde   :  { %518 = vmatmul.f32.gmra.mxu2 %v1453_v63  ;;  %640 = vmatmul.f32.gmra.mxu3 %v214_v22 }
  0xdf   :  { %v1628_v57 = vpop.f32.mrf.mxu0 }
  0xe0   :  { %870 = vmatmul.f32.gmra.mxu1 %v1407_v26 }
  0xe1   :  { %v226_v15 = vpop.f32.mrf.mxu2  ;;  %v387_v7 = vpop.f32.mrf.mxu3 }
  0xe2   :  { %v1631_v14 = vadd.f32 %v387_v7, %v218_v48  ;;  %777 = vmatmul.f32.gmra.mxu0 %v1437_v3 }
  0xe5   :  { %v1634_v4 = vpop.f32.mrf.mxu1 }
  0xe6   :  { %523 = vmatmul.f32.gmra.mxu2 %v1495_v18  ;;  %646 = vmatmul.f32.gmra.mxu3 %v222_v21  ;;  %v340_v18 = vadd.f32 %v1579_v62, %v1573_v44  ;;  %v348_v62 = vadd.f32 %v1601_v58, %v1595_v16 }
  0xe7   :  { %v1639_v53 = vpop.f32.mrf.mxu0 }
  0xe8   :  { %874 = vmatmul.f32.gmra.mxu1 %v1437_v3  ;;  %v336_v3 = vadd.f32 %v1568_v33, %v1564_v39 }
  0xe9   :  { %v234_v20 = vpop.f32.mrf.mxu2  ;;  %v391_v22 = vpop.f32.mrf.mxu3 }
  0xea   :  { %v1642_v26 = vadd.f32 %v391_v22, %v226_v15  ;;  %781 = vmatmul.f32.gmra.mxu0 %v1476_v28 }
  0xed   :  { %v1645_v11 = vpop.f32.mrf.mxu1 }
  0xee   :  { %652 = vmatmul.f32.gmra.mxu3 %v230_v9 }
  0xef   :  { %v722_v35 = vpop.f32.mrf.mxu0 }
  0xf0   :  { %878 = vmatmul.f32.gmra.mxu1 %v1476_v28 }
  0xf1   :  { %v395_v63 = vpop.f32.mrf.mxu3  ;;  %v449_v21 = vpop.f32.mrf.mxu2 }
  0xf2   :  { %v1650_v36 = vadd.f32 %v395_v63, %v234_v20  ;;  %v450_v19 = vadd.f32 %v449_v21, %v336_v3 }
  0xf5   :  { %v819_v60 = vpop.f32.mrf.mxu1 }
  0xf7   :  { %v726_v41 = vpop.f32.mrf.mxu0 }
  0xf9   :  { %v454_v6 = vpop.f32.mrf.mxu2  ;;  %v563_v40 = vpop.f32.mrf.mxu3 }
  0xfa   :  { %v564_v46 = vadd.f32 %v563_v40, %v450_v19  ;;  %v455_v29 = vadd.f32 %v454_v6, %v340_v18  ;;  %v360_v6 = vadd.f32 %v1634_v4, %v1628_v57 }
  0xfc   :  { %v723_v52 = vadd.f32 %v722_v35, %v564_v46  ;;  %v356_v35 = vadd.f32 %v1623_v24, %v1617_v5 }
  0xfd   :  { %v823_v2 = vpop.f32.mrf.mxu1 }
  0xfe   :  { %v820_v9 = vadd.f32 %v819_v60, %v723_v52 }
  0xff   :  { %v730_v28 = vpop.f32.mrf.mxu0 }
 0x100   :  { %886 = vst [vmem:[#allocation7] sm:$0xff] %v820_v9 }
 0x101   :  { %v459_v59 = vpop.f32.mrf.mxu2  ;;  %v569_v32 = vpop.f32.mrf.mxu3 }
 0x102   :  { %v570_v27 = vadd.f32 %v569_v32, %v455_v29  ;;  %v460_v25 = vadd.f32 %v459_v59, %v344_v17 }
 0x104   :  { %v727_v0 = vadd.f32 %v726_v41, %v570_v27 }
 0x105   :  { %v827_v38 = vpop.f32.mrf.mxu1 }
 0x106   :  { %v824_v1 = vadd.f32 %v823_v2, %v727_v0 }
 0x107   :  { %v734_v39 = vpop.f32.mrf.mxu0 }
 0x108   :  { %887 = vst [vmem:[#allocation7 + $0x8] sm:$0xff] %v824_v1 }
 0x109   :  { %v464_v33 = vpop.f32.mrf.mxu2  ;;  %v575_v42 = vpop.f32.mrf.mxu3 }
 0x10a   :  { %v576_v50 = vadd.f32 %v575_v42, %v460_v25  ;;  %v465_v37 = vadd.f32 %v464_v33, %v348_v62 }
 0x10c   :  { %v731_v44 = vadd.f32 %v730_v28, %v576_v50  ;;  %v364_v28 = vadd.f32 %v1645_v11, %v1639_v53 }
 0x10d   :  { %v831_v51 = vpop.f32.mrf.mxu1 }
 0x10e   :  { %v828_v61 = vadd.f32 %v827_v38, %v731_v44 }
 0x10f   :  { %v738_v8 = vpop.f32.mrf.mxu0 }
 0x110   :  { %888 = vst [vmem:[#allocation7 + $0x10] sm:$0xff] %v828_v61 }
 0x111   :  { %v469_v12 = vpop.f32.mrf.mxu2  ;;  %v581_v23 = vpop.f32.mrf.mxu3 }
 0x112   :  { %v582_v13 = vadd.f32 %v581_v23, %v465_v37  ;;  %v470_v15 = vadd.f32 %v469_v12, %v352_v43 }
 0x114   :  { %v735_v31 = vadd.f32 %v734_v39, %v582_v13 }
 0x115   :  { %v835_v30 = vpop.f32.mrf.mxu1 }
 0x116   :  { %v832_v48 = vadd.f32 %v831_v51, %v735_v31 }
 0x117   :  { %v742_v45 = vpop.f32.mrf.mxu0 }
 0x118   :  { %889 = vst [vmem:[#allocation7 + $0x18] sm:$0xff] %v832_v48 }
 0x119   :  { %v474_v7 = vpop.f32.mrf.mxu2  ;;  %v587_v20 = vpop.f32.mrf.mxu3 }
 0x11a   :  { %v588_v22 = vadd.f32 %v587_v20, %v470_v15  ;;  %v475_v60 = vadd.f32 %v474_v7, %v356_v35 }
 0x11c   :  { %v739_v16 = vadd.f32 %v738_v8, %v588_v22 }
 0x11d   :  { %v839_v58 = vpop.f32.mrf.mxu1 }
 0x11e   :  { %v836_v63 = vadd.f32 %v835_v30, %v739_v16 }
 0x11f   :  { %v746_v21 = vpop.f32.mrf.mxu0 }
 0x120   :  { %890 = vst [vmem:[#allocation7 + $0x20] sm:$0xff] %v836_v63 }
 0x121   :  { %v479_v3 = vpop.f32.mrf.mxu2  ;;  %v593_v41 = vpop.f32.mrf.mxu3 }
 0x122   :  { %v594_v19 = vadd.f32 %v593_v41, %v475_v60  ;;  %v480_v52 = vadd.f32 %v479_v3, %v360_v6 }
 0x124   :  { %v743_v10 = vadd.f32 %v742_v45, %v594_v19 }
 0x125   :  { %v843_v54 = vpop.f32.mrf.mxu1 }
 0x126   :  { %v840_v40 = vadd.f32 %v839_v58, %v743_v10 }
 0x127   :  { %v750_v46 = vpop.f32.mrf.mxu0 }
 0x128   :  { %891 = vst [vmem:[#allocation7 + $0x28] sm:$0xff] %v840_v40 }
 0x129   :  { %v484_v2 = vpop.f32.mrf.mxu2  ;;  %v599_v18 = vpop.f32.mrf.mxu3 }
 0x12a   :  { %v600_v9 = vadd.f32 %v599_v18, %v480_v52  ;;  %v485_v32 = vadd.f32 %v484_v2, %v364_v28 }
 0x12c   :  { %v747_v5 = vadd.f32 %v746_v21, %v600_v9 }
 0x12d   :  { %v847_v24 = vpop.f32.mrf.mxu1 }
 0x12e   :  { %v844_v29 = vadd.f32 %v843_v54, %v747_v5 }
 0x12f   :  { %v754_v59 = vpop.f32.mrf.mxu0 }
 0x130   :  { %892 = vst [vmem:[#allocation7 + $0x30] sm:$0xff] %v844_v29 }
 0x131   :  { %v489_v27 = vpop.f32.mrf.mxu2  ;;  %v605_v0 = vpop.f32.mrf.mxu3 }
 0x132   :  { %v606_v38 = vadd.f32 %v605_v0, %v485_v32  ;;  %v490_v39 = vadd.f32 %v489_v27, %v1576_v55 }
 0x134   :  { %v751_v57 = vadd.f32 %v750_v46, %v606_v38 }
 0x135   :  { %v851_v4 = vpop.f32.mrf.mxu1 }
 0x136   :  { %v848_v17 = vadd.f32 %v847_v24, %v751_v57 }
 0x137   :  { %v758_v1 = vpop.f32.mrf.mxu0 }
 0x138   :  { %893 = vst [vmem:[#allocation7 + $0x38] sm:$0xff] %v848_v17 }
 0x139   :  { %v494_v25 = vpop.f32.mrf.mxu2  ;;  %v611_v33 = vpop.f32.mrf.mxu3 }
 0x13a   :  { %v612_v42 = vadd.f32 %v611_v33, %v490_v39  ;;  %v495_v51 = vadd.f32 %v494_v25, %v1587_v56 }
 0x13c   :  { %v755_v50 = vadd.f32 %v754_v59, %v612_v42 }
 0x13d   :  { %v855_v44 = vpop.f32.mrf.mxu1 }
 0x13e   :  { %v852_v53 = vadd.f32 %v851_v4, %v755_v50 }
 0x13f   :  { %v762_v11 = vpop.f32.mrf.mxu0 }
 0x140   :  { %894 = vst [vmem:[#allocation7 + $0x40] sm:$0xff] %v852_v53 }
 0x141   :  { %v499_v62 = vpop.f32.mrf.mxu2  ;;  %v617_v61 = vpop.f32.mrf.mxu3 }
 0x142   :  { %v618_v8 = vadd.f32 %v617_v61, %v495_v51  ;;  %v500_v13 = vadd.f32 %v499_v62, %v1598_v47 }
 0x144   :  { %v759_v37 = vadd.f32 %v758_v1, %v618_v8 }
 0x145   :  { %v859_v12 = vpop.f32.mrf.mxu1 }
 0x146   :  { %v856_v23 = vadd.f32 %v855_v44, %v759_v37 }
 0x147   :  { %v766_v55 = vpop.f32.mrf.mxu0 }
 0x148   :  { %895 = vst [vmem:[#allocation7 + $0x48] sm:$0xff] %v856_v23 }
 0x149   :  { %v504_v31 = vpop.f32.mrf.mxu2  ;;  %v623_v30 = vpop.f32.mrf.mxu3 }
 0x14a   :  { %v624_v43 = vadd.f32 %v623_v30, %v500_v13  ;;  %v505_v7 = vadd.f32 %v504_v31, %v1609_v49 }
 0x14c   :  { %v763_v48 = vadd.f32 %v762_v11, %v624_v43 }
 0x14d   :  { %v863_v45 = vpop.f32.mrf.mxu1 }
 0x14e   :  { %v860_v15 = vadd.f32 %v859_v12, %v763_v48 }
 0x14f   :  { %v770_v16 = vpop.f32.mrf.mxu0 }
 0x150   :  { %896 = vst [vmem:[#allocation7 + $0x50] sm:$0xff] %v860_v15 }
 0x151   :  { %v509_v56 = vpop.f32.mrf.mxu2  ;;  %v629_v20 = vpop.f32.mrf.mxu3 }
 0x152   :  { %v630_v22 = vadd.f32 %v629_v20, %v505_v7  ;;  %v510_v47 = vadd.f32 %v509_v56, %v1620_v34 }
 0x154   :  { %v767_v58 = vadd.f32 %v766_v55, %v630_v22 }
 0x155   :  { %v867_v35 = vpop.f32.mrf.mxu1 }
 0x156   :  { %v864_v63 = vadd.f32 %v863_v45, %v767_v58 }
 0x157   :  { %v774_v19 = vpop.f32.mrf.mxu0 }
 0x158   :  { %897 = vst [vmem:[#allocation7 + $0x58] sm:$0xff] %v864_v63 }
 0x159   :  { %v514_v21 = vpop.f32.mrf.mxu2  ;;  %v635_v60 = vpop.f32.mrf.mxu3 }
 0x15a   :  { %v636_v3 = vadd.f32 %v635_v60, %v510_v47  ;;  %v515_v49 = vadd.f32 %v514_v21, %v1631_v14 }
 0x15c   :  { %v771_v41 = vadd.f32 %v770_v16, %v636_v3 }
 0x15d   :  { %v871_v54 = vpop.f32.mrf.mxu1 }
 0x15e   :  { %v868_v10 = vadd.f32 %v867_v35, %v771_v41 }
 0x15f   :  { %v778_v18 = vpop.f32.mrf.mxu0 }
 0x160   :  { %898 = vst [vmem:[#allocation7 + $0x60] sm:$0xff] %v868_v10 }
 0x161   :  { %v641_v6 = vpop.f32.mrf.mxu3  ;;  %v519_v46 = vpop.f32.mrf.mxu2 }
 0x162   :  { %v642_v40 = vadd.f32 %v641_v6, %v515_v49  ;;  %v520_v9 = vadd.f32 %v519_v46, %v1642_v26 }
 0x164   :  { %v775_v52 = vadd.f32 %v774_v19, %v642_v40 }
 0x165   :  { %v875_v5 = vpop.f32.mrf.mxu1 }
 0x166   :  { %v872_v2 = vadd.f32 %v871_v54, %v775_v52 }
 0x167   :  { %v782_v27 = vpop.f32.mrf.mxu0 }
 0x168   :  { %899 = vst [vmem:[#allocation7 + $0x68] sm:$0xff] %v872_v2 }
 0x169   :  { %v647_v34 = vpop.f32.mrf.mxu3  ;;  %v524_v29 = vpop.f32.mrf.mxu2 }
 0x16a   :  { %v648_v24 = vadd.f32 %v647_v34, %v520_v9  ;;  %v525_v32 = vadd.f32 %v524_v29, %v1650_v36 }
 0x16c   :  { %v779_v28 = vadd.f32 %v778_v18, %v648_v24 }
 0x16d   :  { %v879_v38 = vpop.f32.mrf.mxu1 }
 0x16e   :  { %v876_v59 = vadd.f32 %v875_v5, %v779_v28 }
 0x170   :  { %900 = vst [vmem:[#allocation7 + $0x70] sm:$0xff] %v876_v59 }
 0x171   :  { %v653_v14 = vpop.f32.mrf.mxu3 }
 0x172   :  { %v654_v0 = vadd.f32 %v653_v14, %v525_v32 }
 0x174   :  { %v783_v26 = vadd.f32 %v782_v27, %v654_v0 }
 0x176   :  { %v880_v57 = vadd.f32 %v879_v38, %v783_v26 }
 0x178   :  { %901 = vst [vmem:[#allocation7 + $0x78] sm:$0xff] %v880_v57 }
 0x179   :  { %966 = dma.vmem_to_hbm [thread:$0]  %s959_s1, 2048, %s961_s23, [#allocation4], %s1090_s17, %s1090_s17, %s1091_s18  }
 0x17a   :  { %1087 = dma.done.wait [#allocation4], 2048  }
 0x17b   :  { %1088 = vsyncadd [#allocation4], 4294965248 }
 0x17c   :  { %971 = vsyncpa [#allocation3], 1 }
 0x17d   :  { %972 = vsyncpa [#allocation6], 1 }
 0x17e   :  { %973 = vsyncpa [#allocation4], 1 }

</bundles_post_ra>
